<compile_context>
chip_gen: v7x
topology: tpu7x:2x2x1
jax: 0.10.0
libtpu: 0.0.40
codegen_flags: <defaults>
</compile_context>

<pallas_src>
import functools

import jax
import jax.numpy as jnp
from jax import lax
from jax.experimental import pallas as pl
from jax.experimental.pallas import tpu as pltpu

KSIZE = 5   # conv + pool kernel size
PAD = 2     # conv + pool padding
LANES = 128


def _round_up(x, m):
    return (x + m - 1) // m * m


def _vmem_capacity_bytes():
    """Per-core VMEM capacity; conservative 64 MiB fallback (v7x per-TC) if unavailable."""
    try:
        info_fn = getattr(pltpu, "get_tpu_info", None)
        if info_fn is not None:
            cap = int(getattr(info_fn(), "vmem_capacity_bytes"))
            if cap > 0:
                return cap
    except Exception:
        pass
    return 64 * 1024 * 1024


def _downconv_kernel(scale_ref, shift_ref, x_ref, w1_ref, b1_ref, w2_ref, b2_ref,
                     pooled_ref, before_pool_ref, *,
                     sample_len_pad, sample_len, out_len, num_samples, mxu_dtype):
    """One grid step = `num_samples` batch elements, flattened into rows.

    x_ref:           (num_samples*sample_len_pad, C_in)   channels-last rows (f32)
    w1_ref:          (KSIZE*C_in,  C_pad)                 fused-tap conv1 weights (mxu_dtype)
    w2_ref:          (KSIZE*C_pad, C_pad)                 fused-tap conv2 weights (mxu_dtype)
    pooled_ref:      (num_samples*out_len,        C_pad)  lane-dense output (f32)
    before_pool_ref: (num_samples*sample_len_pad, C_pad)  lane-dense output (f32)
    """
    m, c_in = x_ref.shape
    c_pad = w1_ref.shape[1]
    Lp = sample_len_pad      # (even) padded per-sample length inside the flat buffer
    Lt = sample_len          # true per-sample length (conv/pool boundary)

    # Row position within a sample: pure function of the row index (no input DMA needed).
    pos_in = lax.broadcasted_iota(jnp.int32, (m, c_in), 0) % Lp
    pos_out = lax.broadcasted_iota(jnp.int32, (m, c_pad), 0) % Lp

    def taps(val, pos):
        """im2col along lanes: 5 conv taps (row offsets -2..+2 within each sample).

        Static rolls over the flat (batch-folded) buffer; the pos-based masks zero both the
        intra-sample boundary taps (PyTorch zero padding) and the buffer-end wraparound rows.
        """
        cols = []
        for k in range(KSIZE):
            off = k - PAD
            if off == 0:
                cols.append(val)
                continue
            rolled = jnp.roll(val, -off, axis=0)                  # rolled[l] = val[l + off]
            valid = (pos >= -off) if off < 0 else (pos < (Lt - off))
            cols.append(jnp.where(valid, rolled, 0.0))
        return jnp.concatenate(cols, axis=-1)

    # ---- BatchNorm1d (batch statistics folded into per-channel scale/shift) ----
    xb = x_ref[...] * scale_ref[...] + shift_ref[...]             # (m, C_in) f32

    # ---- conv1 + ReLU: one fused MXU matmul, K = KSIZE*C_in ----
    h1 = jnp.dot(taps(xb, pos_in).astype(mxu_dtype), w1_ref[...],
                 preferred_element_type=jnp.float32) + b1_ref[...]
    h1 = jnp.maximum(h1, 0.0)                                     # (m, C_pad) f32

    # ---- conv2 + ReLU: one fused MXU matmul, K = KSIZE*C_pad ----
    h2 = jnp.dot(taps(h1, pos_out).astype(mxu_dtype), w2_ref[...],
                 preferred_element_type=jnp.float32) + b2_ref[...]
    h2 = jnp.maximum(h2, 0.0)                                     # (m, C_pad) f32

    before_pool_ref[...] = h2                                     # lane-dense store

    # ---- MaxPool1d(kernel=5, stride=2, padding=2) ----
    # pooled[j] = max(h2[2j-2], h2[2j-1], h2[2j], h2[2j+1], h2[2j+2]) within the sample.
    # Read even/odd stride-2 views of the just-written output block (loads are cheaper than
    # stores) and take maxes over out_len rows only. ReLU guarantees h2 >= 0, so 0.0 is a
    # safe fill for out-of-range taps (the window always contains the valid center E[j]).
    fo = num_samples * out_len
    E = before_pool_ref[pl.ds(0, fo, stride=2), :]                # rows 2j
    O = before_pool_ref[pl.ds(1, fo, stride=2), :]                # rows 2j+1
    jpos = lax.broadcasted_iota(jnp.int32, (fo, c_pad), 0) % out_len
    prev_ok = jpos >= 1                                           # rows 2j-2, 2j-1 in range
    o_ok = (2 * jpos + 1) < Lt                                    # row 2j+1 in range
    nxt_ok = (2 * jpos + 2) < Lt                                  # row 2j+2 in range
    res = jnp.maximum(E, jnp.where(o_ok, O, 0.0))
    res = jnp.maximum(res, jnp.where(prev_ok, jnp.roll(E, 1, axis=0), 0.0))
    res = jnp.maximum(res, jnp.where(prev_ok, jnp.roll(O, 1, axis=0), 0.0))
    res = jnp.maximum(res, jnp.where(nxt_ok, jnp.roll(E, -1, axis=0), 0.0))
    pooled_ref[...] = res


def _choose_batch_tile(n, L_pad, out_len, c_in, c_pad, budget, w_itemsize):
    """Largest per-step batch tile that fits the VMEM budget, keeps block shapes
    sublane-aligned, and (if possible) leaves >= 2 grid steps (v7x: 2 TensorCores)."""

    def vmem_bytes(bt):
        m = bt * L_pad
        fo = bt * out_len
        # double-buffered streamed I/O (f32 x rows + f32 outputs)
        stream = 2 * 4 * (m * c_in + (m + fo) * c_pad)
        # grid-invariant operands (assume double-buffered, to stay conservative)
        weights = 2 * (w_itemsize * KSIZE * (c_in + c_pad) * c_pad + 4 * 2 * (c_in + c_pad))
        # live values: im2col taps (f32 + MXU-dtype copy), h1/h2, masks, iotas
        live = (4 * m * ((KSIZE + 2) * c_in + (KSIZE + 3) * c_pad)
                + w_itemsize * m * KSIZE * (c_in + c_pad))
        return stream + weights + live

    def aligned(bt):
        if bt == n:                     # blocks cover the full arrays -> always legal
            return True
        return (bt * L_pad) % 8 == 0 and (bt * out_len) % 8 == 0

    cands = [d for d in range(1, n + 1) if n % d == 0 and aligned(d)]   # never empty (d=n)
    fit = [d for d in cands if vmem_bytes(d) <= budget]
    if fit:
        multi = [d for d in fit if n // d >= 2]
        return max(multi) if multi else max(fit)
    return min(cands)                   # alignment-safe fallback (smallest VMEM footprint)


def downconv_forward_nlc(x_nlc, gamma, beta, w1, b1, w2, b2, eps=1e-5,
                         mxu_dtype=jnp.bfloat16):
    """DownConv forward, channels-last core. x_nlc: (N, L, C_in).

    Returns (pooled, before_pool) channels-last: (N, L_out, C_out), (N, L, C_out).
    MXU operands are bf16 by default (f32 accumulation, f32 elementwise math); pass
    mxu_dtype=jnp.float32 for bit-accurate-vs-f32 reference checks.
    """
    n, L, c_in = x_nlc.shape
    c_out = w1.shape[0]
    out_len = (L + 2 * PAD - KSIZE) // 2 + 1
    c_pad = _round_up(c_out, LANES)
    Lp = L + (L % 2)                    # pad each sample to even length (strided fast path)

    # BatchNorm1d training-mode batch statistics folded into per-channel scale/shift.
    x32 = x_nlc.astype(jnp.float32)
    mean = jnp.mean(x32, axis=(0, 1))
    var = jnp.var(x32, axis=(0, 1))                       # biased variance, as in PyTorch BN
    scale_v = gamma.astype(jnp.float32) * lax.rsqrt(var + eps)
    shift_v = beta.astype(jnp.float32) - mean * scale_v
    scale = scale_v.reshape(1, c_in)
    shift = shift_v.reshape(1, c_in)

    # Batch folded into rows (row = b*Lp + l); for even L this is a reshape, not a transpose.
    if Lp != L:
        x32 = jnp.pad(x32, ((0, 0), (0, Lp - L), (0, 0)))
    x_flat = x32.reshape(n * Lp, c_in)

    # Fused-tap weight matrices: rows ordered (k, c_in), columns lane-padded to C_pad.
    # Cast to the MXU dtype here (once), not inside the kernel every grid step.
    w1_mat = jnp.transpose(w1, (2, 1, 0)).reshape(KSIZE * c_in, c_out)
    w1_mat = jnp.pad(w1_mat, ((0, 0), (0, c_pad - c_out))).astype(mxu_dtype)
    b1_row = jnp.pad(b1.reshape(1, c_out), ((0, 0), (0, c_pad - c_out))).astype(jnp.float32)
    w2_t = jnp.transpose(w2, (2, 1, 0))                   # (K, C_in=C_out, C_out)
    w2_t = jnp.pad(w2_t, ((0, 0), (0, c_pad - c_out), (0, c_pad - c_out)))
    w2_mat = w2_t.reshape(KSIZE * c_pad, c_pad).astype(mxu_dtype)
    b2_row = jnp.pad(b2.reshape(1, c_out), ((0, 0), (0, c_pad - c_out))).astype(jnp.float32)

    # Generation-aware VMEM sizing (128 MiB v5e/v6e, 64 MiB/TC v7x).
    vmem_cap = _vmem_capacity_bytes()
    budget = int(vmem_cap * 0.55)
    vmem_limit = max(32 * 1024 * 1024, min(int(vmem_cap * 0.85), 100 * 1024 * 1024))
    w_itemsize = jnp.dtype(mxu_dtype).itemsize

    bt = _choose_batch_tile(n, Lp, out_len, c_in, c_pad, budget, w_itemsize)
    grid = n // bt
    m = bt * Lp

    kernel = functools.partial(_downconv_kernel, sample_len_pad=Lp, sample_len=L,
                               out_len=out_len, num_samples=bt, mxu_dtype=mxu_dtype)

    flops = 2 * n * Lp * KSIZE * (c_in + c_pad) * c_pad
    bytes_accessed = int(4 * n * Lp * c_in
                         + w_itemsize * KSIZE * (c_in + c_pad) * c_pad
                         + 4 * (n * Lp + n * out_len) * c_pad)

    pooled_flat, before_flat = pl.pallas_call(
        kernel,
        out_shape=(
            jax.ShapeDtypeStruct((n * out_len, c_pad), jnp.float32),
            jax.ShapeDtypeStruct((n * Lp, c_pad), jnp.float32),
        ),
        grid_spec=pltpu.PrefetchScalarGridSpec(
            num_scalar_prefetch=0,
            grid=(grid,),
            in_specs=[
                pl.BlockSpec((1, c_in), lambda i: (0, 0)),               # BN scale
                pl.BlockSpec((1, c_in), lambda i: (0, 0)),               # BN shift
                pl.BlockSpec((m, c_in), lambda i: (i, 0)),               # x rows
                pl.BlockSpec((KSIZE * c_in, c_pad), lambda i: (0, 0)),   # W1 (fused taps)
                pl.BlockSpec((1, c_pad), lambda i: (0, 0)),              # b1
                pl.BlockSpec((KSIZE * c_pad, c_pad), lambda i: (0, 0)),  # W2 (fused taps)
                pl.BlockSpec((1, c_pad), lambda i: (0, 0)),              # b2
            ],
            out_specs=[
                pl.BlockSpec((bt * out_len, c_pad), lambda i: (i, 0)),   # pooled
                pl.BlockSpec((m, c_pad), lambda i: (i, 0)),              # before_pool
            ],
        ),
        compiler_params=pltpu.CompilerParams(
            dimension_semantics=("parallel",),
            vmem_limit_bytes=vmem_limit,
        ),
        cost_estimate=pl.CostEstimate(flops=flops, transcendentals=0,
                                      bytes_accessed=bytes_accessed),
    )(scale, shift, x_flat, w1_mat, b1_row, w2_mat, b2_row)

    pooled = pooled_flat.reshape(n, out_len, c_pad)[..., :c_out]
    before_pool = before_flat.reshape(n, Lp, c_pad)[:, :L, :c_out]
    return pooled, before_pool


def downconv_forward(x_ncl, gamma, beta, w1, b1, w2, b2, eps=1e-5,
                     mxu_dtype=jnp.bfloat16):
    """PyTorch-layout entry point. x_ncl: (N, C_in, L). Returns (pooled, before_pool) in NCL.

    Prefer downconv_forward_nlc and a channels-last pipeline to avoid the NCL<->NLC
    transpose round trips on a memory-bound block.
    """
    x_nlc = jnp.transpose(x_ncl, (0, 2, 1))
    pooled_nlc, before_nlc = downconv_forward_nlc(x_nlc, gamma, beta, w1, b1, w2, b2,
                                                  eps=eps, mxu_dtype=mxu_dtype)
    return (jnp.transpose(pooled_nlc, (0, 2, 1)),
            jnp.transpose(before_nlc, (0, 2, 1)))


def _reference_forward(x, gamma, beta, w1, b1, w2, b2, eps=1e-5):
    """Pure-JAX reference matching PyTorch semantics (NCL layout)."""
    mean = jnp.mean(x, axis=(0, 2), keepdims=True)
    var = jnp.var(x, axis=(0, 2), keepdims=True)
    xbn = gamma[None, :, None] * (x - mean) / jnp.sqrt(var + eps) + beta[None, :, None]

    dn = ("NCH", "OIH", "NCH")
    h = lax.conv_general_dilated(xbn, w1, (1,), [(PAD, PAD)], dimension_numbers=dn)
    h = jnp.maximum(h + b1[None, :, None], 0.0)
    h = lax.conv_general_dilated(h, w2, (1,), [(PAD, PAD)], dimension_numbers=dn)
    before_pool = jnp.maximum(h + b2[None, :, None], 0.0)

    pooled = lax.reduce_window(before_pool, -jnp.inf, lax.max,
                               window_dimensions=(1, 1, KSIZE),
                               window_strides=(1, 1, 2),
                               padding=((0, 0), (0, 0), (PAD, PAD)))
    return pooled, before_pool


if __name__ == "__main__":
    N, C_IN, C_OUT, L = 2, 4, 8, 16

    key = jax.random.PRNGKey(0)
    kx, kg, kb, kw1, kb1, kw2, kb2, kx2 = jax.random.split(key, 8)

    x = jax.random.normal(kx, (N, C_IN, L), dtype=jnp.float32)
    # Parameters (deterministic synthetic init; shapes from DownConv.__init__).
    gamma = 1.0 + 0.1 * jax.random.normal(kg, (C_IN,), dtype=jnp.float32)
    beta = 0.1 * jax.random.normal(kb, (C_IN,), dtype=jnp.float32)
    w1 = 0.2 * jax.random.normal(kw1, (C_OUT, C_IN, KSIZE), dtype=jnp.float32)
    b1 = 0.1 * jax.random.normal(kb1, (C_OUT,), dtype=jnp.float32)
    w2 = 0.2 * jax.random.normal(kw2, (C_OUT, C_OUT, KSIZE), dtype=jnp.float32)
    b2 = 0.1 * jax.random.normal(kb2, (C_OUT,), dtype=jnp.float32)

    ref_pooled, ref_before = _reference_forward(x, gamma, beta, w1, b1, w2, b2)

    # 1) Strict numerical check with f32 MXU operands.
    fwd_f32 = jax.jit(functools.partial(downconv_forward, mxu_dtype=jnp.float32))
    pooled, before_pool = fwd_f32(x, gamma, beta, w1, b1, w2, b2)
    jax.block_until_ready((pooled, before_pool))
    assert pooled.shape == ref_pooled.shape and before_pool.shape == ref_before.shape
    assert jnp.allclose(pooled, ref_pooled, atol=1e-4, rtol=1e-4), "pooled mismatch (f32)"
    assert jnp.allclose(before_pool, ref_before, atol=1e-4, rtol=1e-4), "before_pool mismatch (f32)"

    # 2) Default fast path: bf16 MXU operands, f32 accumulation (looser tolerance expected).
    fwd_bf16 = jax.jit(downconv_forward)
    pooled_bf, before_bf = fwd_bf16(x, gamma, beta, w1, b1, w2, b2)
    jax.block_until_ready((pooled_bf, before_bf))
    assert jnp.allclose(pooled_bf, ref_pooled, atol=8e-2, rtol=8e-2), "pooled mismatch (bf16)"
    assert jnp.allclose(before_bf, ref_before, atol=8e-2, rtol=8e-2), "before_pool mismatch (bf16)"

    # 3) Odd sequence length exercises the internal pad-to-even + mask path.
    x_odd = jax.random.normal(kx2, (N, C_IN, 15), dtype=jnp.float32)
    pooled_o, before_o = fwd_f32(x_odd, gamma, beta, w1, b1, w2, b2)
    jax.block_until_ready((pooled_o, before_o))
    ref_pooled_o, ref_before_o = _reference_forward(x_odd, gamma, beta, w1, b1, w2, b2)
    assert pooled_o.shape == ref_pooled_o.shape and before_o.shape == ref_before_o.shape
    assert jnp.allclose(pooled_o, ref_pooled_o, atol=1e-4, rtol=1e-4), "pooled mismatch (odd L)"
    assert jnp.allclose(before_o, ref_before_o, atol=1e-4, rtol=1e-4), "before_pool mismatch (odd L)"

    print("KERNEL_OK")
</pallas_src>

<mosaic_0001>
module attributes {stable_mosaic.version = 11 : i64} {
  func.func @_downconv_kernel(%arg0: i32, %arg1: memref<1x4xf32, #tpu.memory_space<vmem>>, %arg2: memref<1x4xf32, #tpu.memory_space<vmem>>, %arg3: memref<16x4xf32, #tpu.memory_space<vmem>>, %arg4: memref<20x128xf32, #tpu.memory_space<vmem>>, %arg5: memref<1x128xf32, #tpu.memory_space<vmem>>, %arg6: memref<640x128xf32, #tpu.memory_space<vmem>>, %arg7: memref<1x128xf32, #tpu.memory_space<vmem>>, %arg8: memref<8x128xf32, #tpu.memory_space<vmem>>, %arg9: memref<16x128xf32, #tpu.memory_space<vmem>>) attributes {dimension_semantics = [#tpu.dimension_semantics<parallel>], iteration_bounds = array<i64: 2>, scalar_prefetch = 0 : i64, scratch_operands = 0 : i64, tpu.core_type = #tpu.core_type<tc>, window_params = [{pipeline_mode = #tpu.pipeline_mode<synchronous>, transform_indices = @transform_0, window_bounds = array<i64: 1, 4>}, {pipeline_mode = #tpu.pipeline_mode<synchronous>, transform_indices = @transform_1, window_bounds = array<i64: 1, 4>}, {transform_indices = @transform_2, window_bounds = array<i64: 16, 4>}, {pipeline_mode = #tpu.pipeline_mode<synchronous>, transform_indices = @transform_3, window_bounds = array<i64: 20, 128>}, {pipeline_mode = #tpu.pipeline_mode<synchronous>, transform_indices = @transform_4, window_bounds = array<i64: 1, 128>}, {pipeline_mode = #tpu.pipeline_mode<synchronous>, transform_indices = @transform_5, window_bounds = array<i64: 640, 128>}, {pipeline_mode = #tpu.pipeline_mode<synchronous>, transform_indices = @transform_6, window_bounds = array<i64: 1, 128>}, {transform_indices = @transform_7, window_bounds = array<i64: 8, 128>}, {transform_indices = @transform_8, window_bounds = array<i64: 16, 128>}]} {
    %0 = tpu.iota {dimensions = array<i32: 0>} : vector<16x4xi32>
    %c16_i32 = arith.constant 16 : i32
    %c0_i32 = arith.constant 0 : i32
    %1 = arith.cmpi eq, %c16_i32, %c0_i32 : i32
    %c1_i32 = arith.constant 1 : i32
    %2 = arith.select %1, %c1_i32, %c16_i32 : i32
    %3 = vector.broadcast %2 : i32 to vector<16x4xi32>
    %4 = arith.remsi %0, %3 : vector<16x4xi32>
    %c0_i32_0 = arith.constant 0 : i32
    %5 = vector.broadcast %c0_i32_0 : i32 to vector<16x4xi32>
    %6 = arith.cmpi ne, %4, %5 : vector<16x4xi32>
    %c0_i32_1 = arith.constant 0 : i32
    %7 = vector.broadcast %c0_i32_1 : i32 to vector<16x4xi32>
    %8 = arith.cmpi slt, %4, %7 : vector<16x4xi32>
    %c0_i32_2 = arith.constant 0 : i32
    %9 = arith.cmpi slt, %2, %c0_i32_2 : i32
    %10 = vector.broadcast %9 : i1 to vector<16x4xi1>
    %11 = vector.broadcast %10 : vector<16x4xi1> to vector<16x4xi1>
    %12 = arith.xori %8, %11 : vector<16x4xi1>
    %13 = arith.andi %12, %6 : vector<16x4xi1>
    %14 = vector.broadcast %2 : i32 to vector<16x4xi32>
    %15 = arith.addi %4, %14 : vector<16x4xi32>
    %16 = arith.select %13, %15, %4 : vector<16x4xi1>, vector<16x4xi32>
    %17 = tpu.iota {dimensions = array<i32: 0>} : vector<16x128xi32>
    %c16_i32_3 = arith.constant 16 : i32
    %c0_i32_4 = arith.constant 0 : i32
    %18 = arith.cmpi eq, %c16_i32_3, %c0_i32_4 : i32
    %c1_i32_5 = arith.constant 1 : i32
    %19 = arith.select %18, %c1_i32_5, %c16_i32_3 : i32
    %20 = vector.broadcast %19 : i32 to vector<16x128xi32>
    %21 = arith.remsi %17, %20 : vector<16x128xi32>
    %c0_i32_6 = arith.constant 0 : i32
    %22 = vector.broadcast %c0_i32_6 : i32 to vector<16x128xi32>
    %23 = arith.cmpi ne, %21, %22 : vector<16x128xi32>
    %c0_i32_7 = arith.constant 0 : i32
    %24 = vector.broadcast %c0_i32_7 : i32 to vector<16x128xi32>
    %25 = arith.cmpi slt, %21, %24 : vector<16x128xi32>
    %c0_i32_8 = arith.constant 0 : i32
    %26 = arith.cmpi slt, %19, %c0_i32_8 : i32
    %27 = vector.broadcast %26 : i1 to vector<16x128xi1>
    %28 = vector.broadcast %27 : vector<16x128xi1> to vector<16x128xi1>
    %29 = arith.xori %25, %28 : vector<16x128xi1>
    %30 = arith.andi %29, %23 : vector<16x128xi1>
    %31 = vector.broadcast %19 : i32 to vector<16x128xi32>
    %32 = arith.addi %21, %31 : vector<16x128xi32>
    %33 = arith.select %30, %32, %21 : vector<16x128xi1>, vector<16x128xi32>
    %c0 = arith.constant 0 : index
    %c0_9 = arith.constant 0 : index
    %34 = vector.load %arg3[%c0, %c0_9] : memref<16x4xf32, #tpu.memory_space<vmem>>, vector<16x4xf32>
    %c0_10 = arith.constant 0 : index
    %c0_11 = arith.constant 0 : index
    %35 = vector.load %arg1[%c0_10, %c0_11] : memref<1x4xf32, #tpu.memory_space<vmem>>, vector<1x4xf32>
    %36 = vector.broadcast %35 : vector<1x4xf32> to vector<16x4xf32>
    %37 = arith.mulf %34, %36 : vector<16x4xf32>
    %c0_12 = arith.constant 0 : index
    %c0_13 = arith.constant 0 : index
    %38 = vector.load %arg2[%c0_12, %c0_13] : memref<1x4xf32, #tpu.memory_space<vmem>>, vector<1x4xf32>
    %39 = vector.broadcast %38 : vector<1x4xf32> to vector<16x4xf32>
    %40 = arith.addf %37, %39 : vector<16x4xf32>
    %41 = vector.extract_strided_slice %40 {offsets = [14, 0], sizes = [2, 4], strides = [1, 1]} : vector<16x4xf32> to vector<2x4xf32>
    %42 = vector.extract_strided_slice %40 {offsets = [0, 0], sizes = [14, 4], strides = [1, 1]} : vector<16x4xf32> to vector<14x4xf32>
    %43 = tpu.concatenate %41, %42 in 0 : vector<2x4xf32>, vector<14x4xf32> -> vector<16x4xf32>
    %c2_i32 = arith.constant 2 : i32
    %44 = vector.broadcast %c2_i32 : i32 to vector<16x4xi32>
    %45 = arith.cmpi sge, %16, %44 : vector<16x4xi32>
    %cst = arith.constant 0.000000e+00 : f32
    %46 = vector.broadcast %cst : f32 to vector<16x4xf32>
    %47 = arith.select %45, %43, %46 : vector<16x4xi1>, vector<16x4xf32>
    %48 = vector.extract_strided_slice %40 {offsets = [15, 0], sizes = [1, 4], strides = [1, 1]} : vector<16x4xf32> to vector<1x4xf32>
    %49 = vector.extract_strided_slice %40 {offsets = [0, 0], sizes = [15, 4], strides = [1, 1]} : vector<16x4xf32> to vector<15x4xf32>
    %50 = tpu.concatenate %48, %49 in 0 : vector<1x4xf32>, vector<15x4xf32> -> vector<16x4xf32>
    %c1_i32_14 = arith.constant 1 : i32
    %51 = vector.broadcast %c1_i32_14 : i32 to vector<16x4xi32>
    %52 = arith.cmpi sge, %16, %51 : vector<16x4xi32>
    %cst_15 = arith.constant 0.000000e+00 : f32
    %53 = vector.broadcast %cst_15 : f32 to vector<16x4xf32>
    %54 = arith.select %52, %50, %53 : vector<16x4xi1>, vector<16x4xf32>
    %55 = vector.extract_strided_slice %40 {offsets = [1, 0], sizes = [15, 4], strides = [1, 1]} : vector<16x4xf32> to vector<15x4xf32>
    %56 = vector.extract_strided_slice %40 {offsets = [0, 0], sizes = [1, 4], strides = [1, 1]} : vector<16x4xf32> to vector<1x4xf32>
    %57 = tpu.concatenate %55, %56 in 0 : vector<15x4xf32>, vector<1x4xf32> -> vector<16x4xf32>
    %c15_i32 = arith.constant 15 : i32
    %58 = vector.broadcast %c15_i32 : i32 to vector<16x4xi32>
    %59 = arith.cmpi slt, %16, %58 : vector<16x4xi32>
    %cst_16 = arith.constant 0.000000e+00 : f32
    %60 = vector.broadcast %cst_16 : f32 to vector<16x4xf32>
    %61 = arith.select %59, %57, %60 : vector<16x4xi1>, vector<16x4xf32>
    %62 = vector.extract_strided_slice %40 {offsets = [2, 0], sizes = [14, 4], strides = [1, 1]} : vector<16x4xf32> to vector<14x4xf32>
    %63 = vector.extract_strided_slice %40 {offsets = [0, 0], sizes = [2, 4], strides = [1, 1]} : vector<16x4xf32> to vector<2x4xf32>
    %64 = tpu.concatenate %62, %63 in 0 : vector<14x4xf32>, vector<2x4xf32> -> vector<16x4xf32>
    %c14_i32 = arith.constant 14 : i32
    %65 = vector.broadcast %c14_i32 : i32 to vector<16x4xi32>
    %66 = arith.cmpi slt, %16, %65 : vector<16x4xi32>
    %cst_17 = arith.constant 0.000000e+00 : f32
    %67 = vector.broadcast %cst_17 : f32 to vector<16x4xf32>
    %68 = arith.select %66, %64, %67 : vector<16x4xi1>, vector<16x4xf32>
    %69 = tpu.concatenate %47, %54, %40, %61, %68 in 1 : vector<16x4xf32>, vector<16x4xf32>, vector<16x4xf32>, vector<16x4xf32>, vector<16x4xf32> -> vector<16x20xf32>
    %c0_18 = arith.constant 0 : index
    %c0_19 = arith.constant 0 : index
    %70 = vector.load %arg4[%c0_18, %c0_19] : memref<20x128xf32, #tpu.memory_space<vmem>>, vector<20x128xf32>
    %cst_20 = arith.constant dense<0.000000e+00> : vector<16x128xf32>
    %71 = tpu.matmul %69, %70, %cst_20 {dimension_numbers = #tpu.dot_dimension_numbers<[1], [0], [0], [1], [0, 0, 1, 1], [], []>} : vector<16x20xf32>, vector<20x128xf32>, vector<16x128xf32> -> vector<16x128xf32>
    %c0_21 = arith.constant 0 : index
    %c0_22 = arith.constant 0 : index
    %72 = vector.load %arg5[%c0_21, %c0_22] : memref<1x128xf32, #tpu.memory_space<vmem>>, vector<1x128xf32>
    %73 = vector.broadcast %72 : vector<1x128xf32> to vector<16x128xf32>
    %74 = arith.addf %71, %73 : vector<16x128xf32>
    %cst_23 = arith.constant 0.000000e+00 : f32
    %75 = vector.broadcast %cst_23 : f32 to vector<16x128xf32>
    %76 = arith.maximumf %74, %75 : vector<16x128xf32>
    %77 = vector.extract_strided_slice %76 {offsets = [14, 0], sizes = [2, 128], strides = [1, 1]} : vector<16x128xf32> to vector<2x128xf32>
    %78 = vector.extract_strided_slice %76 {offsets = [0, 0], sizes = [14, 128], strides = [1, 1]} : vector<16x128xf32> to vector<14x128xf32>
    %79 = tpu.concatenate %77, %78 in 0 : vector<2x128xf32>, vector<14x128xf32> -> vector<16x128xf32>
    %c2_i32_24 = arith.constant 2 : i32
    %80 = vector.broadcast %c2_i32_24 : i32 to vector<16x128xi32>
    %81 = arith.cmpi sge, %33, %80 : vector<16x128xi32>
    %cst_25 = arith.constant 0.000000e+00 : f32
    %82 = vector.broadcast %cst_25 : f32 to vector<16x128xf32>
    %83 = arith.select %81, %79, %82 : vector<16x128xi1>, vector<16x128xf32>
    %84 = vector.extract_strided_slice %76 {offsets = [15, 0], sizes = [1, 128], strides = [1, 1]} : vector<16x128xf32> to vector<1x128xf32>
    %85 = vector.extract_strided_slice %76 {offsets = [0, 0], sizes = [15, 128], strides = [1, 1]} : vector<16x128xf32> to vector<15x128xf32>
    %86 = tpu.concatenate %84, %85 in 0 : vector<1x128xf32>, vector<15x128xf32> -> vector<16x128xf32>
    %c1_i32_26 = arith.constant 1 : i32
    %87 = vector.broadcast %c1_i32_26 : i32 to vector<16x128xi32>
    %88 = arith.cmpi sge, %33, %87 : vector<16x128xi32>
    %cst_27 = arith.constant 0.000000e+00 : f32
    %89 = vector.broadcast %cst_27 : f32 to vector<16x128xf32>
    %90 = arith.select %88, %86, %89 : vector<16x128xi1>, vector<16x128xf32>
    %91 = vector.extract_strided_slice %76 {offsets = [1, 0], sizes = [15, 128], strides = [1, 1]} : vector<16x128xf32> to vector<15x128xf32>
    %92 = vector.extract_strided_slice %76 {offsets = [0, 0], sizes = [1, 128], strides = [1, 1]} : vector<16x128xf32> to vector<1x128xf32>
    %93 = tpu.concatenate %91, %92 in 0 : vector<15x128xf32>, vector<1x128xf32> -> vector<16x128xf32>
    %c15_i32_28 = arith.constant 15 : i32
    %94 = vector.broadcast %c15_i32_28 : i32 to vector<16x128xi32>
    %95 = arith.cmpi slt, %33, %94 : vector<16x128xi32>
    %cst_29 = arith.constant 0.000000e+00 : f32
    %96 = vector.broadcast %cst_29 : f32 to vector<16x128xf32>
    %97 = arith.select %95, %93, %96 : vector<16x128xi1>, vector<16x128xf32>
    %98 = vector.extract_strided_slice %76 {offsets = [2, 0], sizes = [14, 128], strides = [1, 1]} : vector<16x128xf32> to vector<14x128xf32>
    %99 = vector.extract_strided_slice %76 {offsets = [0, 0], sizes = [2, 128], strides = [1, 1]} : vector<16x128xf32> to vector<2x128xf32>
    %100 = tpu.concatenate %98, %99 in 0 : vector<14x128xf32>, vector<2x128xf32> -> vector<16x128xf32>
    %c14_i32_30 = arith.constant 14 : i32
    %101 = vector.broadcast %c14_i32_30 : i32 to vector<16x128xi32>
    %102 = arith.cmpi slt, %33, %101 : vector<16x128xi32>
    %cst_31 = arith.constant 0.000000e+00 : f32
    %103 = vector.broadcast %cst_31 : f32 to vector<16x128xf32>
    %104 = arith.select %102, %100, %103 : vector<16x128xi1>, vector<16x128xf32>
    %105 = tpu.concatenate %83, %90, %76, %97, %104 in 1 : vector<16x128xf32>, vector<16x128xf32>, vector<16x128xf32>, vector<16x128xf32>, vector<16x128xf32> -> vector<16x640xf32>
    %c0_32 = arith.constant 0 : index
    %c0_33 = arith.constant 0 : index
    %106 = vector.load %arg6[%c0_32, %c0_33] : memref<640x128xf32, #tpu.memory_space<vmem>>, vector<640x128xf32>
    %cst_34 = arith.constant dense<0.000000e+00> : vector<16x128xf32>
    %107 = tpu.matmul %105, %106, %cst_34 {dimension_numbers = #tpu.dot_dimension_numbers<[1], [0], [0], [1], [0, 0, 1, 1], [], []>} : vector<16x640xf32>, vector<640x128xf32>, vector<16x128xf32> -> vector<16x128xf32>
    %c0_35 = arith.constant 0 : index
    %c0_36 = arith.constant 0 : index
    %108 = vector.load %arg7[%c0_35, %c0_36] : memref<1x128xf32, #tpu.memory_space<vmem>>, vector<1x128xf32>
    %109 = vector.broadcast %108 : vector<1x128xf32> to vector<16x128xf32>
    %110 = arith.addf %107, %109 : vector<16x128xf32>
    %cst_37 = arith.constant 0.000000e+00 : f32
    %111 = vector.broadcast %cst_37 : f32 to vector<16x128xf32>
    %112 = arith.maximumf %110, %111 : vector<16x128xf32>
    %c0_38 = arith.constant 0 : index
    %c0_39 = arith.constant 0 : index
    %113 = vector.load %arg9[%c0_38, %c0_39] : memref<16x128xf32, #tpu.memory_space<vmem>>, vector<16x128xf32>
    tpu.vector_store %arg9[%c0_38, %c0_39], %112 {strides = array<i32>} : memref<16x128xf32, #tpu.memory_space<vmem>>, vector<16x128xf32>,
    %c0_40 = arith.constant 0 : index
    %c0_41 = arith.constant 0 : index
    %114 = tpu.strided_load %arg9[%c0_40, %c0_41] {strides = array<i32: 2, 1>} : memref<16x128xf32, #tpu.memory_space<vmem>>, vector<8x128xf32>
    %c1 = arith.constant 1 : index
    %c0_42 = arith.constant 0 : index
    %115 = tpu.strided_load %arg9[%c1, %c0_42] {strides = array<i32: 2, 1>} : memref<16x128xf32, #tpu.memory_space<vmem>>, vector<8x128xf32>
    %116 = tpu.iota {dimensions = array<i32: 0>} : vector<8x128xi32>
    %c8_i32 = arith.constant 8 : i32
    %c0_i32_43 = arith.constant 0 : i32
    %117 = arith.cmpi eq, %c8_i32, %c0_i32_43 : i32
    %c1_i32_44 = arith.constant 1 : i32
    %118 = arith.select %117, %c1_i32_44, %c8_i32 : i32
    %119 = vector.broadcast %118 : i32 to vector<8x128xi32>
    %120 = arith.remsi %116, %119 : vector<8x128xi32>
    %c0_i32_45 = arith.constant 0 : i32
    %121 = vector.broadcast %c0_i32_45 : i32 to vector<8x128xi32>
    %122 = arith.cmpi ne, %120, %121 : vector<8x128xi32>
    %c0_i32_46 = arith.constant 0 : i32
    %123 = vector.broadcast %c0_i32_46 : i32 to vector<8x128xi32>
    %124 = arith.cmpi slt, %120, %123 : vector<8x128xi32>
    %c0_i32_47 = arith.constant 0 : i32
    %125 = arith.cmpi slt, %118, %c0_i32_47 : i32
    %126 = vector.broadcast %125 : i1 to vector<8x128xi1>
    %127 = vector.broadcast %126 : vector<8x128xi1> to vector<8x128xi1>
    %128 = arith.xori %124, %127 : vector<8x128xi1>
    %129 = arith.andi %128, %122 : vector<8x128xi1>
    %130 = vector.broadcast %118 : i32 to vector<8x128xi32>
    %131 = arith.addi %120, %130 : vector<8x128xi32>
    %132 = arith.select %129, %131, %120 : vector<8x128xi1>, vector<8x128xi32>
    %c1_i32_48 = arith.constant 1 : i32
    %133 = vector.broadcast %c1_i32_48 : i32 to vector<8x128xi32>
    %134 = arith.cmpi sge, %132, %133 : vector<8x128xi32>
    %c2_i32_49 = arith.constant 2 : i32
    %135 = vector.broadcast %c2_i32_49 : i32 to vector<8x128xi32>
    %136 = arith.muli %135, %132 : vector<8x128xi32>
    %c1_i32_50 = arith.constant 1 : i32
    %137 = vector.broadcast %c1_i32_50 : i32 to vector<8x128xi32>
    %138 = arith.addi %136, %137 : vector<8x128xi32>
    %c16_i32_51 = arith.constant 16 : i32
    %139 = vector.broadcast %c16_i32_51 : i32 to vector<8x128xi32>
    %140 = arith.cmpi slt, %138, %139 : vector<8x128xi32>
    %c2_i32_52 = arith.constant 2 : i32
    %141 = vector.broadcast %c2_i32_52 : i32 to vector<8x128xi32>
    %142 = arith.muli %141, %132 : vector<8x128xi32>
    %c2_i32_53 = arith.constant 2 : i32
    %143 = vector.broadcast %c2_i32_53 : i32 to vector<8x128xi32>
    %144 = arith.addi %142, %143 : vector<8x128xi32>
    %c16_i32_54 = arith.constant 16 : i32
    %145 = vector.broadcast %c16_i32_54 : i32 to vector<8x128xi32>
    %146 = arith.cmpi slt, %144, %145 : vector<8x128xi32>
    %cst_55 = arith.constant 0.000000e+00 : f32
    %147 = vector.broadcast %cst_55 : f32 to vector<8x128xf32>
    %148 = arith.select %140, %115, %147 : vector<8x128xi1>, vector<8x128xf32>
    %149 = arith.maximumf %114, %148 : vector<8x128xf32>
    %150 = vector.extract_strided_slice %114 {offsets = [7, 0], sizes = [1, 128], strides = [1, 1]} : vector<8x128xf32> to vector<1x128xf32>
    %151 = vector.extract_strided_slice %114 {offsets = [0, 0], sizes = [7, 128], strides = [1, 1]} : vector<8x128xf32> to vector<7x128xf32>
    %152 = tpu.concatenate %150, %151 in 0 : vector<1x128xf32>, vector<7x128xf32> -> vector<8x128xf32>
    %cst_56 = arith.constant 0.000000e+00 : f32
    %153 = vector.broadcast %cst_56 : f32 to vector<8x128xf32>
    %154 = arith.select %134, %152, %153 : vector<8x128xi1>, vector<8x128xf32>
    %155 = arith.maximumf %149, %154 : vector<8x128xf32>
    %156 = vector.extract_strided_slice %115 {offsets = [7, 0], sizes = [1, 128], strides = [1, 1]} : vector<8x128xf32> to vector<1x128xf32>
    %157 = vector.extract_strided_slice %115 {offsets = [0, 0], sizes = [7, 128], strides = [1, 1]} : vector<8x128xf32> to vector<7x128xf32>
    %158 = tpu.concatenate %156, %157 in 0 : vector<1x128xf32>, vector<7x128xf32> -> vector<8x128xf32>
    %cst_57 = arith.constant 0.000000e+00 : f32
    %159 = vector.broadcast %cst_57 : f32 to vector<8x128xf32>
    %160 = arith.select %134, %158, %159 : vector<8x128xi1>, vector<8x128xf32>
    %161 = arith.maximumf %155, %160 : vector<8x128xf32>
    %162 = vector.extract_strided_slice %114 {offsets = [1, 0], sizes = [7, 128], strides = [1, 1]} : vector<8x128xf32> to vector<7x128xf32>
    %163 = vector.extract_strided_slice %114 {offsets = [0, 0], sizes = [1, 128], strides = [1, 1]} : vector<8x128xf32> to vector<1x128xf32>
    %164 = tpu.concatenate %162, %163 in 0 : vector<7x128xf32>, vector<1x128xf32> -> vector<8x128xf32>
    %cst_58 = arith.constant 0.000000e+00 : f32
    %165 = vector.broadcast %cst_58 : f32 to vector<8x128xf32>
    %166 = arith.select %146, %164, %165 : vector<8x128xi1>, vector<8x128xf32>
    %167 = arith.maximumf %161, %166 : vector<8x128xf32>
    %c0_59 = arith.constant 0 : index
    %c0_60 = arith.constant 0 : index
    %168 = vector.load %arg8[%c0_59, %c0_60] : memref<8x128xf32, #tpu.memory_space<vmem>>, vector<8x128xf32>
    tpu.vector_store %arg8[%c0_59, %c0_60], %167 {strides = array<i32>} : memref<8x128xf32, #tpu.memory_space<vmem>>, vector<8x128xf32>,
    return
  }
  func.func @transform_0(%arg0: i32) -> (i32, i32) {
    %c0_i32 = arith.constant 0 : i32
    %c0_i32_0 = arith.constant 0 : i32
    %c0_i32_1 = arith.constant 0 : i32
    return %c0_i32, %c0_i32_0 : i32, i32
  }
  func.func @transform_1(%arg0: i32) -> (i32, i32) {
    %c0_i32 = arith.constant 0 : i32
    %c0_i32_0 = arith.constant 0 : i32
    %c0_i32_1 = arith.constant 0 : i32
    return %c0_i32, %c0_i32_0 : i32, i32
  }
  func.func @transform_2(%arg0: i32) -> (i32, i32) {
    %c0_i32 = arith.constant 0 : i32
    %c0_i32_0 = arith.constant 0 : i32
    return %arg0, %c0_i32 : i32, i32
  }
  func.func @transform_3(%arg0: i32) -> (i32, i32) {
    %c0_i32 = arith.constant 0 : i32
    %c0_i32_0 = arith.constant 0 : i32
    %c0_i32_1 = arith.constant 0 : i32
    return %c0_i32, %c0_i32_0 : i32, i32
  }
  func.func @transform_4(%arg0: i32) -> (i32, i32) {
    %c0_i32 = arith.constant 0 : i32
    %c0_i32_0 = arith.constant 0 : i32
    %c0_i32_1 = arith.constant 0 : i32
    return %c0_i32, %c0_i32_0 : i32, i32
  }
  func.func @transform_5(%arg0: i32) -> (i32, i32) {
    %c0_i32 = arith.constant 0 : i32
    %c0_i32_0 = arith.constant 0 : i32
    %c0_i32_1 = arith.constant 0 : i32
    return %c0_i32, %c0_i32_0 : i32, i32
  }
  func.func @transform_6(%arg0: i32) -> (i32, i32) {
    %c0_i32 = arith.constant 0 : i32
    %c0_i32_0 = arith.constant 0 : i32
    %c0_i32_1 = arith.constant 0 : i32
    return %c0_i32, %c0_i32_0 : i32, i32
  }
  func.func @transform_7(%arg0: i32) -> (i32, i32) {
    %c0_i32 = arith.constant 0 : i32
    %c0_i32_0 = arith.constant 0 : i32
    return %arg0, %c0_i32 : i32, i32
  }
  func.func @transform_8(%arg0: i32) -> (i32, i32) {
    %c0_i32 = arith.constant 0 : i32
    %c0_i32_0 = arith.constant 0 : i32
    return %arg0, %c0_i32 : i32, i32
  }
}

</mosaic_0001>

<bundles_post_ra>
// kernel: downconv_forward.1
= control target key start
LH: loop header
LB: loop body
LE: loop exit
PB: predicated region body
PF: predicated region fallthrough
CT: control target
= control target key end

     0   :  { %s1375_s27 = smov 0   ;;  %s1747_s0 = inlined_call_operand.vmem [shape: f32[1,4], index: 0, kind: input, shape index: {}]   ;;  %s1748_s1 = inlined_call_operand.vmem [shape: f32[1,4], index: 1, kind: input, shape index: {}]   ;;  %s1749_s2 = inlined_call_operand.vmem [shape: f32[32,4], index: 2, kind: input, shape index: {}]   ;;  %s1750_s3 = inlined_call_operand.vmem [shape: f32[20,128], index: 3, kind: input, shape index: {}]   ;;  %s1751_s4 = inlined_call_operand.vmem [shape: f32[1,128], index: 4, kind: input, shape index: {}]   ;;  %s1752_s5 = inlined_call_operand.vmem [shape: f32[640,128], index: 5, kind: input, shape index: {}]   ;;  %s1753_s6 = inlined_call_operand.vmem [shape: f32[1,128], index: 6, kind: input, shape index: {}]   ;;  %s1754_s7 = inlined_call_operand.vmem [shape: f32[16,128], index: 7, kind: output, shape index: {0}]   ;;  %s1755_s8 = inlined_call_operand.vmem [shape: f32[32,128], index: 8, kind: output, shape index: {1}]  }
   0x1 LB: > { %s1381_s28 = sadd.s32 4294967295, %s1324_s27   ;;  %p1043_p0 = scmp.ge.s32.totalorder %s1324_s27, 1  ;;  %s1324_s27 = sphi %s1375_s27, %s19_s27  }
   0x2   : > { %p266_p1 = scmp.lt.s32.totalorder %s1324_s27, 3 }
   0x4   : > { %p267_p2 = pnand %p1043_p0, %p266_p1 }
   0x5   : > { %s1044_s29 = sshll.u32 (!%p267_p2), %s1381_s28, 1  ;;  %v320_v0 = vlaneseq (!%p267_p2)  ;;  %v1049_v2 = vld [vmem:[%s1747_s0] ss:$0 sm:$0xff] (!%p267_p2)  ;;  %v460_v10 = vld [vmem:[%s1750_s3 + $0x8] sm:$0xff] (!%p267_p2)  ;;  %vm383_vm0 = vcmask (!%p267_p2), 1040384   ;;  %vm393_vm1 = vcmask (!%p267_p2), 1046528  }
   0x6   : > { %270 = sbr.rel (%p267_p2) target bundleno = 641 (0x281), region = 48  ;;  %p305_p3 = scmp.lt.s32.totalorder (!%p267_p2), %s1044_s29, 3  ;;  %v1050_v4 = vld [vmem:[%s1748_s1] ss:$0 sm:$0xff] (!%p267_p2)  ;;  %vm371_vm2 = vcmask (!%p267_p2), 1041408   ;;  %vm405_vm4 = vcmask (!%p267_p2), 1045504  }
   0x7   : > { %v1386_v1 = vshrl.u32 (!%p267_p2), %v320_v0, 7  ;;  %v459_v7 = vld [vmem:[%s1750_s3] sm:$0xff] (!%p267_p2)  ;;  %s1326_s20 = smov (!%p267_p2), 8   ;;  %v461_v27 = vld [vmem:[%s1750_s3 + $0x10] sm:$0xf] (!%p267_p2)  ;;  %s1327_s23 = smov (!%p267_p2), 4  }
   0x8   : > { %v1206_v12 = vpack.c.bf16 (!%p267_p2), %v460_v10, %v459_v7  ;;  %vm476_vm5 = vcmask (!%p267_p2), 1043456   ;;  %v611_v31 = vld [vmem:[%s1752_s5 + $0x80] sm:$0xff] (!%p267_p2)  ;;  %v612_v32 = vld [vmem:[%s1752_s5 + $0x88] sm:$0xff] (!%p267_p2)  ;;  %v613_v45 = vld [vmem:[%s1752_s5 + $0x90] sm:$0xff] (!%p267_p2)  ;;  %s1329_s18 = smov (!%p267_p2), 16   ;;  %vm447_vm9 = vcmask (!%p267_p2), 31744  }
   0x9   : > { %v322_v3 = vadd.s32 (!%p267_p2), 8, %v1386_v1  ;;  %v327_v20 = vand.u32 (!%p267_p2), 15, %v1386_v1  ;;  %v595_v33 = vld [vmem:[%s1752_s5] sm:$0xff] (!%p267_p2)  ;;  %v1210_v37 = vpack.c.bf16 (!%p267_p2), %v612_v32, %v611_v31  ;;  %v596_v38 = vld [vmem:[%s1752_s5 + $0x8] sm:$0xff] (!%p267_p2)  ;;  %v614_v46 = vld [vmem:[%s1752_s5 + $0x98] sm:$0xff] (!%p267_p2)  ;;  %vm450_vm10 = vcmask (!%p267_p2), 64512  }
   0xa   : > { %1207 = vmatprep.subr.bf16.mxu0 (!%p267_p2), %v1206_v12  ;;  %v643_v39 = vld [vmem:[%s1752_s5 + $0x180] sm:$0xff] (!%p267_p2)  ;;  %v644_v40 = vld [vmem:[%s1752_s5 + $0x188] sm:$0xff] (!%p267_p2)  ;;  %v1212_v43 = vpack.c.bf16 (!%p267_p2), %v596_v38, %v595_v33  ;;  %v597_v47 = vld [vmem:[%s1752_s5 + $0x10] sm:$0xff] (!%p267_p2)  ;;  %v1214_v50 = vpack.c.bf16 (!%p267_p2), %v614_v46, %v613_v45  ;;  %vm453_vm11 = vcmask (!%p267_p2), 97280   ;;  %vm456_vm12 = vcmask (!%p267_p2), 130048   ;;  %p310_p4 = scmp.lt.s32.totalorder (!%p267_p2), %s1381_s28, 1 }
   0xb   : > { %v334_v11 = vand.u32 (!%p267_p2), 15, %v322_v3  ;;  %1209 = vmatpush3.bf16.msra.mxu0 (!%p267_p2), %v1206_v12  ;;  %vm1455_vm6 = vcmp.ge.s32.totalorder (!%p267_p2), %v327_v20, 1  ;;  %v1242_v44 = vpack.c.bf16 (!%p267_p2), %v644_v40, %v643_v39  ;;  %1211 = vmatprep.subr.bf16.mxu1 (!%p267_p2), %v1210_v37  ;;  %v598_v48 = vld [vmem:[%s1752_s5 + $0x18] sm:$0xff] (!%p267_p2)  ;;  %v615_v53 = vld [vmem:[%s1752_s5 + $0xa0] sm:$0xff] (!%p267_p2)  ;;  %v616_v54 = vld [vmem:[%s1752_s5 + $0xa8] sm:$0xff] (!%p267_p2)  ;;  %vm1541_vm8 = vcmp.ge.s32.totalorder (!%p267_p2), %v327_v20, 2 }
   0xc   : > { %1166 = vmatprep.subr.msk.mxu0 (!%p267_p2), %vm476_vm5, %v461_v27  ;;  %1213 = vmatpush3.bf16.msra.mxu1 (!%p267_p2), %v1212_v43  ;;  %v1216_v51 = vpack.c.bf16 (!%p267_p2), %v598_v48, %v597_v47  ;;  %v1218_v55 = vpack.c.bf16 (!%p267_p2), %v616_v54, %v615_v53  ;;  %v599_v56 = vld [vmem:[%s1752_s5 + $0x20] sm:$0xff] (!%p267_p2)  ;;  %v600_v57 = vld [vmem:[%s1752_s5 + $0x28] sm:$0xff] (!%p267_p2)  ;;  %v617_v60 = vld [vmem:[%s1752_s5 + $0xb0] sm:$0xff] (!%p267_p2)  ;;  %vm469_vm13 = vcmask (!%p267_p2), 162816  }
   0xd   : > { %s1765_s29 = smov (!%p305_p3, %s1044_s29), 3  ;;  %vm1418_vm3 = vcmp.lt.s32.totalorder %v334_v11, 15  ;;  %vm1469_vm7 = vcmp.lt.s32.totalorder %v334_v11, 14  ;;  %1215 = vmatprep.subr.bf16.mxu1 %v1214_v50  ;;  %v1220_v59 = vpack.c.bf16 %v600_v57, %v599_v56  ;;  %v618_v61 = vld [vmem:[%s1752_s5 + $0xb8] sm:$0xff]  ;;  %v601_v62 = vld [vmem:[%s1752_s5 + $0x30] sm:$0xff]  ;;  %v619_v3 = vld [vmem:[%s1752_s5 + $0xc0] sm:$0xff] }
   0xe   : > { %s1045_s30 = sshll.u32 %s1765_s29, 3  ;;  %v1222_v63 = vpack.c.bf16 %v618_v61, %v617_v60  ;;  %v602_v0 = vld [vmem:[%s1752_s5 + $0x38] sm:$0xff]  ;;  %v604_v7 = vld [vmem:[%s1752_s5 + $0x48] sm:$0xff]  ;;  %v605_v11 = vld [vmem:[%s1752_s5 + $0x50] sm:$0xff]  ;;  %s1767_s28 = smov (!%p310_p4, %s1381_s28), 1 }
   0xf   : > { %s308_s13 = scalar_lea.vmem %s1749_s2, %s1045_s30  ;;  %1167 = vmatpush3.msk.msra.mxu0 %vm476_vm5, %v461_v27  ;;  %v622_v10 = vld [vmem:[%s1752_s5 + $0xd8] sm:$0xff]  ;;  %v627_v27 = vld [vmem:[%s1752_s5 + $0x100] sm:$0xff]  ;;  %v628_v20 = vld [vmem:[%s1752_s5 + $0x108] sm:$0xff]  ;;  %s1046_s29 = sshll.u32 %s1767_s28, 3 }
  0x10   : > { %v347_v5 = vld [vmem:[%s308_s13] sm:$0xff]  ;;  %v348_v6 = vld [vmem:[%s308_s13 + $0x8] sm:$0xff]  ;;  %1243 = vmatprep.subr.bf16.mxu0 %v1242_v44  ;;  %1217 = vmatpush3.bf16.msra.mxu1 %v1216_v51  ;;  %v645_v31 = vld [vmem:[%s1752_s5 + $0x190] sm:$0xff]  ;;  %s318_s13 = scalar_lea.vmem %s1755_s8, %s1045_s30  ;;  %s313_s15 = scalar_lea.vmem %s1754_s7, %s1046_s29 }
  0x11   : > { %v356_v8 = vmul.f32 %v1049_v2, %v347_v5  ;;  %v357_v9 = vmul.f32 %v1049_v2, %v348_v6  ;;  %1219 = vmatprep.subr.bf16.mxu1 %v1218_v55  ;;  %v1224_v2 = vpack.c.bf16 %v602_v0, %v601_v62  ;;  %v603_v5 = vld [vmem:[%s1752_s5 + $0x40] sm:$0xff]  ;;  %v629_v40 = vld [vmem:[%s1752_s5 + $0x110] sm:$0xff]  ;;  %v648_v45 = vld [vmem:[%s1752_s5 + $0x1a8] sm:$0xff] }
  0x12   : > { %v647_v44 = vld [vmem:[%s1752_s5 + $0x1a0] sm:$0xff]  ;;  %v649_v50 = vld [vmem:[%s1752_s5 + $0x1b0] sm:$0xff]  ;;  %v650_v51 = vld [vmem:[%s1752_s5 + $0x1b8] sm:$0xff] }
  0x13   : > { %v1409_v13 = vadd.f32 %v1050_v4, %v356_v8  ;;  %v1411_v14 = vadd.f32 %v1050_v4, %v357_v9  ;;  %v620_v4 = vld [vmem:[%s1752_s5 + $0xc8] sm:$0xff]  ;;  %v1228_v8 = vpack.c.bf16 %v604_v7, %v603_v5  ;;  %v621_v9 = vld [vmem:[%s1752_s5 + $0xd0] sm:$0xff]  ;;  %v1250_v47 = vpack.c.bf16 %v648_v45, %v647_v44  ;;  %v631_v48 = vld [vmem:[%s1752_s5 + $0x120] sm:$0xff] }
  0x14   : > { %1221 = vmatpush3.bf16.msra.mxu1 %v1220_v59  ;;  %v1226_v6 = vpack.c.bf16 %v620_v4, %v619_v3  ;;  %v1230_v12 = vpack.c.bf16 %v622_v10, %v621_v9  ;;  %v1254_v53 = vpack.c.bf16 %v650_v51, %v649_v50  ;;  %v633_v54 = vld [vmem:[%s1752_s5 + $0x130] sm:$0xff]  ;;  %v634_v55 = vld [vmem:[%s1752_s5 + $0x138] sm:$0xff]  ;;  %v651_v56 = vld [vmem:[%s1752_s5 + $0x1c0] sm:$0xff] }
  0x15   : > { %425 = vrot.lane.b32.xlu1 %v1409_v13, %s1326_s20  ;;  %v381_v15 = vrot.slane %v1411_v14, 7  ;;  %v384_v16 = vrot.slane %v1409_v13, 7  ;;  %v394_v17 = vrot.slane %v1409_v13, 1  ;;  %v395_v18 = vrot.slane %v1411_v14, 1  ;;  %1223 = vmatprep.subr.bf16.mxu1 %v1222_v63  ;;  %v652_v57 = vld [vmem:[%s1752_s5 + $0x1c8] sm:$0xff]  ;;  %v635_v60 = vld [vmem:[%s1752_s5 + $0x140] sm:$0xff] }
  0x16   : > { %v368_v21 = vrot.slane %v1411_v14, 6  ;;  %v372_v22 = vrot.slane %v1409_v13, 6  ;;  %v406_v25 = vrot.slane %v1409_v13, 2  ;;  %v407_v26 = vrot.slane %v1411_v14, 2  ;;  %v606_v13 = vld [vmem:[%s1752_s5 + $0x58] sm:$0xff]  ;;  %v636_v61 = vld [vmem:[%s1752_s5 + $0x148] sm:$0xff] }
  0x17   : > { %v385_v23 = vsel %vm383_vm0, %v384_v16, %v381_v15  ;;  %v400_v24 = vsel %vm393_vm1, %v395_v18, %v394_v17  ;;  %v396_v28 = vsel %vm393_vm1, %v394_v17, %v395_v18  ;;  %v388_v35 = vsel %vm383_vm0, %v381_v15, %v384_v16  ;;  %v653_v62 = vld [vmem:[%s1752_s5 + $0x1d0] sm:$0xff]  ;;  %v654_v63 = vld [vmem:[%s1752_s5 + $0x1d8] sm:$0xff]  ;;  %v624_v7 = vld [vmem:[%s1752_s5 + $0xe8] sm:$0xff] }
  0x18   : > { %421 = vrot.lane.b32.xlu0 %v385_v23, %s1327_s23  ;;  %v1436_v29 = vsel %vm371_vm2, %v372_v22, %v368_v21  ;;  %v1439_v30 = vsel %vm371_vm2, %v368_v21, %v372_v22  ;;  %v404_v34 = vsel %vm1418_vm3, %v400_v24, 0.0  ;;  %v412_v41 = vsel %vm405_vm4, %v407_v26, %v406_v25  ;;  %1225 = vmatpush3.bf16.msra.mxu1 %v1224_v2  ;;  %v637_v3 = vld [vmem:[%s1752_s5 + $0x150] sm:$0xff]  ;;  %v638_v4 = vld [vmem:[%s1752_s5 + $0x158] sm:$0xff]  ;;  %v607_v9 = vld [vmem:[%s1752_s5 + $0x60] sm:$0xff] }
  0x19   : > { %427 = vrot.lane.b32.xlu1 %v1411_v14, %s1326_s20  ;;  %s1328_s20 = smov 12   ;;  %v391_v49 = vsel %vm1455_vm6, %v388_v35, 0.0  ;;  %v416_v52 = vsel %vm1469_vm7, %v412_v41, 0.0  ;;  %v408_v58 = vsel %vm405_vm4, %v406_v25, %v407_v26  ;;  %1227 = vmatprep.subr.bf16.mxu1 %v1226_v6  ;;  %v1232_v14 = vpack.c.bf16 %v606_v13, %v605_v11  ;;  %v630_v41 = vld [vmem:[%s1752_s5 + $0x118] sm:$0xff]  ;;  %v623_v6 = vld [vmem:[%s1752_s5 + $0xe0] sm:$0xff]  ;;  %v608_v10 = vld [vmem:[%s1752_s5 + $0x68] sm:$0xff] }
  0x1a   : > { %v379_v23 = vsel %vm1541_vm8, %v1439_v30, 0.0  ;;  %v1244_v35 = vpack.c.bf16 %v628_v20, %v627_v27  ;;  %v1248_v46 = vpack.c.bf16 %v630_v41, %v629_v40  ;;  %v1258_v59 = vpack.c.bf16 %v652_v57, %v651_v56  ;;  %v655_v11 = vld [vmem:[%s1752_s5 + $0x1e0] sm:$0xff]  ;;  %v656_v13 = vld [vmem:[%s1752_s5 + $0x1e8] sm:$0xff]  ;;  %v658_v20 = vld [vmem:[%s1752_s5 + $0x1f8] sm:$0xff] }
  0x1b   : > { %v1260_v0 = vpack.c.bf16 %v636_v61, %v635_v60  ;;  %v1262_v2 = vpack.c.bf16 %v654_v63, %v653_v62  ;;  %v1264_v5 = vpack.c.bf16 %v638_v4, %v637_v3  ;;  %v661_v44 = vld [vmem:[%s1752_s5 + $0x210] sm:$0xff]  ;;  %v662_v45 = vld [vmem:[%s1752_s5 + $0x218] sm:$0xff]  ;;  %v663_v62 = vld [vmem:[%s1752_s5 + $0x220] sm:$0xff] }
  0x1c   : > { %433 = vrot.lane.b32.xlu0 %v396_v28, %s1328_s20  ;;  %1229 = vmatpush3.bf16.msra.mxu1 %v1228_v8  ;;  %v1234_v8 = vpack.c.bf16 %v624_v7, %v623_v6  ;;  %v664_v63 = vld [vmem:[%s1752_s5 + $0x228] sm:$0xff]  ;;  %v666_v3 = vld [vmem:[%s1752_s5 + $0x238] sm:$0xff]  ;;  %v667_v19 = vld [vmem:[%s1752_s5 + $0x240] sm:$0xff] }
  0x1d   : > { %435 = vrot.lane.b32.xlu1 %v404_v34, %s1328_s20  ;;  %1231 = vmatprep.subr.bf16.mxu1 %v1230_v12  ;;  %v1236_v12 = vpack.c.bf16 %v608_v10, %v607_v9  ;;  %v668_v4 = vld [vmem:[%s1752_s5 + $0x248] sm:$0xff]  ;;  %v669_v6 = vld [vmem:[%s1752_s5 + $0x250] sm:$0xff]  ;;  %v670_v7 = vld [vmem:[%s1752_s5 + $0x258] sm:$0xff] }
  0x1e   : > { %v671_v9 = vld [vmem:[%s1752_s5 + $0x260] sm:$0xff]  ;;  %v672_v10 = vld [vmem:[%s1752_s5 + $0x268] sm:$0xff] }
  0x20   : > { %419 = vrot.lane.b32.xlu0 %v391_v49, %s1327_s23  ;;  %1233 = vmatpush3.bf16.msra.mxu1 %v1232_v14  ;;  %v632_v49 = vld [vmem:[%s1752_s5 + $0x128] sm:$0xff]  ;;  %v639_v14 = vld [vmem:[%s1752_s5 + $0x160] sm:$0xff] }
  0x21   : > { %443 = vrot.lane.b32.xlu1 %v416_v52, %s1329_s18  ;;  %v1252_v52 = vpack.c.bf16 %v632_v49, %v631_v48  ;;  %1235 = vmatprep.subr.bf16.mxu1 %v1234_v8  ;;  %v1294_v8 = vpack.c.bf16 %v670_v7, %v669_v6 }
  0x24   : > { %441 = vrot.lane.b32.xlu0 %v408_v58, %s1329_s18  ;;  %v1256_v58 = vpack.c.bf16 %v634_v55, %v633_v54  ;;  %1237 = vmatpush3.bf16.msra.mxu1 %v1236_v12  ;;  %v1278_v54 = vpack.c.bf16 %v662_v45, %v661_v44  ;;  %v673_v12 = vld [vmem:[%s1752_s5 + $0x270] sm:$0xff] }
  0x87   : > { %v426_v15 = vpop.permute.xlu1 %425 }
  0x8a   : > { %v422_v16 = vpop.permute.xlu0 %421 }
  0x8b   : > { %v428_v17 = vpop.permute.xlu1 %427  ;;  %v449_v25 = vsel %vm447_vm9, %v1436_v29, %v422_v16  ;;  %v646_v29 = vld [vmem:[%s1752_s5 + $0x198] sm:$0xff]  ;;  %v640_v16 = vld [vmem:[%s1752_s5 + $0x168] sm:$0xff] }
  0x8c   : > { %v452_v33 = vsel %vm450_vm10, %v449_v25, %v428_v17  ;;  %v1246_v39 = vpack.c.bf16 %v646_v29, %v645_v31  ;;  %v1268_v17 = vpack.c.bf16 %v640_v16, %v639_v14  ;;  %v610_v25 = vld [vmem:[%s1752_s5 + $0x78] sm:$0xff] }
  0x8d   : > { %v642_v31 = vld [vmem:[%s1752_s5 + $0x178] sm:$0xff] }
  0x8e   : > { %v434_v21 = vpop.permute.xlu0 %433 }
  0x8f   : > { %v436_v22 = vpop.permute.xlu1 %435 }
  0x90   : > { %v455_v37 = vsel %vm453_vm11, %v452_v33, %v436_v22  ;;  %v626_v22 = vld [vmem:[%s1752_s5 + $0xf8] sm:$0xff]  ;;  %v660_v33 = vld [vmem:[%s1752_s5 + $0x208] sm:$0xff] }
  0x92   : > { %v420_v24 = vpop.permute.xlu0 %419 }
  0x93   : > { %v448_v26 = vsel %vm447_vm9, %v379_v23, %v420_v24  ;;  %v444_v30 = vpop.permute.xlu1 %443  ;;  %v609_v24 = vld [vmem:[%s1752_s5 + $0x70] sm:$0xff] }
  0x94   : > { %v451_v28 = vsel %vm450_vm10, %v448_v26, %v426_v15  ;;  %v458_v43 = vsel %vm456_vm12, %v455_v37, %v444_v30  ;;  %v1266_v15 = vpack.c.bf16 %v656_v13, %v655_v11  ;;  %v657_v26 = vld [vmem:[%s1752_s5 + $0x1f0] sm:$0xff]  ;;  %v1240_v27 = vpack.c.bf16 %v610_v25, %v609_v24  ;;  %v674_v13 = vld [vmem:[%s1752_s5 + $0x278] sm:$0xff] }
  0x95   : > { %v454_v32 = vsel %vm453_vm11, %v451_v28, %v434_v21  ;;  %v625_v21 = vld [vmem:[%s1752_s5 + $0xf0] sm:$0xff]  ;;  %v1270_v29 = vpack.c.bf16 %v658_v20, %v657_v26  ;;  %v1298_v11 = vpack.c.bf16 %v672_v10, %v671_v9  ;;  %v1302_v14 = vpack.c.bf16 %v674_v13, %v673_v12 }
  0x96   : > { %v442_v34 = vpop.permute.xlu0 %441  ;;  %v1238_v23 = vpack.c.bf16 %v626_v22, %v625_v21  ;;  %v641_v28 = vld [vmem:[%s1752_s5 + $0x170] sm:$0xff] }
  0x97   : > { %v457_v38 = vsel %vm456_vm12, %v454_v32, %v442_v34  ;;  %v1272_v30 = vpack.c.bf16 %v642_v31, %v641_v28  ;;  %v659_v32 = vld [vmem:[%s1752_s5 + $0x200] sm:$0xff] }
  0x98   : > { %1168 = vmatprep.mubr.msk.f32.mxu0 %vm469_vm13, %v457_v38  ;;  %1239 = vmatprep.subr.bf16.mxu1 %v1238_v23  ;;  %v1274_v34 = vpack.c.bf16 %v660_v33, %v659_v32  ;;  %v918_v33 = vand.u32 7, %v1386_v1 }
  0x99   : > { %1169 = vmatmul.mubr.msk.f32.vlgmr.msra.gmra.mrb[0].mxu0 %vm469_vm13, %v458_v43  ;;  %1241 = vmatpush3.bf16.msra.mxu1 %v1240_v27 }
  0x9a   : > { %1245 = vmatpush3.bf16.msra.mxu0 %v1244_v35  ;;  %1275 = vmatprep.subr.bf16.mxu1 %v1274_v34  ;;  %v1051_v35 = vld [vmem:[%s1751_s4] ss:$0 sm:$0xff]  ;;  %vm926_vm15 = vcmp.ge.s32.totalorder %v918_v33, 1 }
  0x9b   : > { %1247 = vmatprep.subr.bf16.mxu0 %v1246_v39 }
  0x9e   : > { %1249 = vmatpush3.bf16.msra.mxu0 %v1248_v46 }
  0x9f   : > { %1251 = vmatprep.subr.bf16.mxu0 %v1250_v47 }
  0xa2   : > { %1253 = vmatpush3.bf16.msra.mxu0 %v1252_v52 }
  0xa3   : > { %1255 = vmatprep.subr.bf16.mxu0 %v1254_v53 }
  0xa6   : > { %1257 = vmatpush3.bf16.msra.mxu0 %v1256_v58 }
  0xa7   : > { %1259 = vmatprep.subr.bf16.mxu0 %v1258_v59 }
  0xaa   : > { %1261 = vmatpush3.bf16.msra.mxu0 %v1260_v0  ;;  %v1282_v0 = vpack.c.bf16 %v664_v63, %v663_v62 }
  0xab   : > { %1263 = vmatprep.subr.bf16.mxu0 %v1262_v2  ;;  %v665_v2 = vld [vmem:[%s1752_s5 + $0x230] sm:$0xff] }
  0xac   : > { %v1286_v18 = vpack.c.bf16 %v666_v3, %v665_v2 }
  0xae   : > { %1265 = vmatpush3.bf16.msra.mxu0 %v1264_v5  ;;  %v1290_v5 = vpack.c.bf16 %v668_v4, %v667_v19 }
  0xaf   : > { %1267 = vmatprep.subr.bf16.mxu0 %v1266_v15 }
  0xb2   : > { %1269 = vmatpush3.bf16.msra.mxu0 %v1268_v17  ;;  %v1055_v17 = vld [vmem:[%s1753_s6] ss:$0 sm:$0xff] }
  0xb3   : > { %1271 = vmatprep.subr.bf16.mxu0 %v1270_v29 }
  0xb6   : > { %1273 = vmatpush3.bf16.msra.mxu0 %v1272_v30 }
 0x16c   : > { %v1170_v37 = vpop.f32.mrb[0].mxu0 }
 0x16d   : > { %v552_v38 = vadd.f32 %v1170_v37, %v1051_v35  ;;  %v546_v39 = vpop.f32.mrb[1].mxu0 }
 0x16e   : > { %v547_v40 = vadd.f32 %v1051_v35, %v546_v39 }
 0x16f   : > { %v556_v41 = vmax.f32 %v552_v38, 0.0 }
 0x170   : > { %v555_v43 = vmax.f32 %v547_v40, 0.0  ;;  %v927_v40 = vmul.u32 2, %v918_v33 }
 0x171   : > { %v568_v46 = vrot.slane %v556_v41, 7  ;;  %v578_v47 = vrot.slane %v556_v41, 1  ;;  %v558_v48 = vrot.slane %v556_v41, 6  ;;  %v587_v49 = vrot.slane %v556_v41, 2 }
 0x172   : > { %v570_v50 = vrot.slane %v555_v43, 7  ;;  %v577_v51 = vrot.slane %v555_v43, 1  ;;  %v561_v52 = vrot.slane %v555_v43, 6  ;;  %v586_v53 = vrot.slane %v555_v43, 2 }
 0x173   : > { %v930_v45 = vadd.s32 2, %v927_v40 }
 0x174   : > { %v574_v55 = vsel %vm383_vm0, %v568_v46, %v570_v50  ;;  %v579_v56 = vsel %vm393_vm1, %v577_v51, %v578_v47  ;;  %v565_v57 = vsel %vm371_vm2, %v558_v48, %v561_v52  ;;  %v571_v58 = vsel %vm383_vm0, %v570_v50, %v568_v46 }
 0x175   : > { %1056 = vmatprep.mubr.msk.f32.mxu1 %vm1455_vm6, %v574_v55  ;;  %821 = vmatprep.mubr.f32.mxu0 %v579_v56  ;;  %v583_v59 = vsel %vm393_vm1, %v578_v47, %v577_v51  ;;  %v562_v60 = vsel %vm371_vm2, %v561_v52, %v558_v48  ;;  %v588_v61 = vsel %vm405_vm4, %v586_v53, %v587_v49  ;;  %vm931_vm0 = vcmp.lt.s32.totalorder %v930_v45, 16 }
 0x176   : > { %1057 = vmatmul.mubr.msk.f32.vlgmr.msra.gmra.mrb[0].mxu1 %vm1541_vm8, %v565_v57  ;;  %822 = vmatmul.mubr.f32.vlgmr.msra.gmra.mrb[2].mxu0 %v555_v43  ;;  %v592_v36 = vsel %vm405_vm4, %v587_v49, %v586_v53  ;;  %v928_v43 = vadd.s32 1, %v927_v40 }
 0x177   : > { %1277 = vmatpush3.bf16.msra.mxu1 %v1274_v34  ;;  %751 = vmatprep.mubr.f32.mxu1 %v571_v58 }
 0x178   : > { %1058 = vmatprep.mubr.msk.f32.mxu0 %vm1418_vm3, %v583_v59  ;;  %1279 = vmatprep.subr.bf16.mxu1 %v1278_v54  ;;  %vm929_vm14 = vcmp.lt.s32.totalorder %v928_v43, 16 }
 0x17a   : > { %752 = vmatmul.mubr.f32.gmra.mrb[2].mxu1 %v562_v60  ;;  %827 = vmatmul.mubr.f32.gmra.mrb[4].mxu0 %v556_v41 }
 0x17b   : > { %1281 = vmatpush3.bf16.msra.mxu1 %v1278_v54  ;;  %1203 = vmatprep.mubr.f32.mxu1 %v588_v61 }
 0x17c   : > { %1283 = vmatprep.subr.bf16.mxu1 %v1282_v0 }
 0x17f   : > { %1285 = vmatpush3.bf16.msra.mxu1 %v1282_v0 }
 0x180   : > { %1287 = vmatprep.subr.bf16.mxu1 %v1286_v18 }
 0x183   : > { %1289 = vmatpush3.bf16.msra.mxu1 %v1286_v18 }
 0x184   : > { %1291 = vmatprep.subr.bf16.mxu1 %v1290_v5 }
 0x187   : > { %1293 = vmatpush3.bf16.msra.mxu1 %v1290_v5 }
 0x188   : > { %1295 = vmatprep.subr.bf16.mxu1 %v1294_v8 }
 0x18b   : > { %1297 = vmatpush3.bf16.msra.mxu1 %v1294_v8 }
 0x18c   : > { %1299 = vmatprep.subr.bf16.mxu1 %v1298_v11 }
 0x18f   : > { %1301 = vmatpush3.bf16.msra.mxu1 %v1298_v11 }
 0x190   : > { %1303 = vmatprep.subr.bf16.mxu1 %v1302_v14 }
 0x193   : > { %1305 = vmatpush3.bf16.msra.mxu1 %v1302_v14 }
 0x196   : > { %1204 = vmatmul.mubr.msk.f32.vlgmr.msra.gmra.mrb[4].mxu1 %vm1469_vm7, %v592_v36 }
 0x249   : > { %v1100_v15 = vpop.f32.mrb[0].mxu1  ;;  %v1138_v16 = vpop.f32.mrb[2].mxu0 }
 0x24a   : > { %v1101_v21 = vpop.f32.mrb[1].mxu1  ;;  %v1139_v22 = vpop.f32.mrb[3].mxu0 }
 0x24b   : > { %v1102_v23 = vadd.f32 %v1101_v21, %v1100_v15  ;;  %v1140_v24 = vadd.f32 %v1139_v22, %v1138_v16 }
 0x24d   : > { %v749_v25 = vadd.f32 %v1102_v23, %v1055_v17  ;;  %v1103_v26 = vpop.f32.mrb[2].mxu1  ;;  %v1141_v27 = vpop.f32.mrb[4].mxu0 }
 0x24e   : > { %v1104_v20 = vpop.f32.mrb[3].mxu1  ;;  %v1142_v28 = vpop.f32.mrb[5].mxu0 }
 0x24f   : > { %v1105_v31 = vadd.f32 %v1104_v20, %v1103_v26  ;;  %v1143_v29 = vadd.f32 %v1142_v28, %v1141_v27  ;;  %v824_v42 = vadd.f32 %v1140_v24, %v749_v25 }
 0x251   : > { %v754_v30 = vadd.f32 %v1105_v31, %v1055_v17 }
 0x253   : > { %v829_v32 = vadd.f32 %v1143_v29, %v754_v30 }
 0x269   : > { %v1205_v34 = vpop.f32.mrb[4].mxu1 }
 0x26a   : > { %v904_v35 = vadd.f32 %v1205_v34, %v829_v32  ;;  %v898_v37 = vpop.f32.mrb[5].mxu1 }
 0x26b   : > { %v899_v38 = vadd.f32 %v898_v37, %v824_v42 }
 0x26c   : > { %v908_v41 = vmax.f32 %v904_v35, 0.0 }
 0x26d   : > { %v907_v39 = vmax.f32 %v899_v38, 0.0 }
 0x26e   : > { %910 = vst [vmem:[%s318_s13 + $0x8] sm:$0xff] %v908_v41 }
 0x26f   : > { %909 = vst [vmem:[%s318_s13] sm:$0xff] %v907_v39 }
 0x276   : > { %v911_v44 = vld [vmem:[%s318_s13] ss:$2 sm:$0xff]  ;;  %v1060_v1 = vld [vmem:[%s318_s13 + $0x1] ss:$2 sm:$0xff] }
 0x277   : > { %v932_v46 = vsel %vm929_vm14, %v1060_v1, 0.0  ;;  %v935_v47 = vrot.slane %v911_v44, 7  ;;  %v941_v48 = vrot.slane %v1060_v1, 7  ;;  %v946_v51 = vrot.slane %v911_v44, 1 }
 0x278   : > { %v933_v49 = vmax.f32 %v911_v44, %v932_v46 }
 0x279   : > { %v938_v50 = vsel %vm926_vm15, %v935_v47, 0.0  ;;  %v944_v53 = vsel %vm926_vm15, %v941_v48, 0.0  ;;  %v949_v55 = vsel %vm931_vm0, %v946_v51, 0.0 }
 0x27a   : > { %v939_v52 = vmax.f32 %v933_v49, %v938_v50 }
 0x27c   : > { %v945_v54 = vmax.f32 %v939_v52, %v944_v53 }
 0x27e   : > { %v950_v56 = vmax.f32 %v945_v54, %v949_v55 }
 0x280   : > { %951 = vst [vmem:[%s313_s15] sm:$0xff] %v950_v56 }
 0x281 PF: > { %s19_s27 = sadd.s32 1, %s1324_s27  }
 0x282   : > { %p16_p5 = scmp.ge.s32.totalorder %s19_s27, 4  }
 0x284   :  { %18 = sbr.rel (!%p16_p5) target bundleno = 1 (0x1), region = 91 }

</bundles_post_ra>
